<compile_context>
chip_gen: v6e
topology: v6e:2x2x1
jax: 0.10.0
libtpu: 0.0.40
codegen_flags: <defaults>
</compile_context>

<pallas_src>
import math

import jax
import jax.numpy as jnp
from jax import lax
from jax.experimental import pallas as pl


def make_fused_kernel(num_heads, head_dim, inv_scale):
    H, D = num_heads, head_dim
    HD = H * D

    def kernel(text_ref, img_ref, ecg_ref, wq_ref, wkv_ref, bias_ref, wo_ref, out_ref):
        B, S, Ii = img_ref.shape
        Ie = ecg_ref.shape[-1]
        Tin = text_ref.shape[-1]
        Dp = out_ref.shape[-1]

        text = text_ref[...].reshape(B, Tin)          # [B, 1, Tin] -> [B, Tin] (squeeze(1))
        imgf = img_ref[...].reshape(B * S, Ii)
        ecgf = ecg_ref[...].reshape(B * S, Ie)
        bias = bias_ref[...]                          # [3, W]  (bq | bk,bv | bo)

        # --- fused projections (MXU): one dot for Q, one lane-dense dot for K&V of all heads.
        kvf = jnp.concatenate([imgf, ecgf], axis=-1)                                   # [B*S, Ii+Ie]
        q = jnp.dot(text, wq_ref[...],
                    preferred_element_type=jnp.float32) + bias[0:1, :HD]               # [B, HD]
        kv = jnp.dot(kvf, wkv_ref[...],
                     preferred_element_type=jnp.float32) + bias[1:2, :2 * HD]          # [B*S, 2HD]
        k = kv[:, :HD].reshape(B, S, HD)                                               # [B, S, HD]
        v = kv[:, HD:2 * HD]                                                           # [B*S, HD]

        # --- 0/1 head-segment indicator matrices built in-kernel (no extra operands, no int div).
        f_idx = lax.broadcasted_iota(jnp.int32, (HD, H), 0)
        h_off = lax.broadcasted_iota(jnp.int32, (HD, H), 1) * D
        seg = jnp.where((f_idx >= h_off) & (f_idx < h_off + D), 1.0, 0.0
                        ).astype(jnp.float32)                                          # [HD, H]
        h_row = lax.broadcasted_iota(jnp.int32, (H, HD), 0) * D
        f_col = lax.broadcasted_iota(jnp.int32, (H, HD), 1)
        expand = jnp.where((f_col >= h_row) & (f_col < h_row + D), 1.0, 0.0
                           ).astype(jnp.float32)                                       # [H, HD]

        # --- attention for all heads at once (single query token per batch).
        p = (q[:, None, :] * k).reshape(B * S, HD)                                     # VPU
        scores = (jnp.dot(p, seg, preferred_element_type=jnp.float32)
                  * inv_scale).reshape(B, S, H)                                        # [B, S, H]
        m = jnp.max(scores, axis=1, keepdims=True)                                     # stable softmax
        e = jnp.exp(scores - m)
        denom = jnp.sum(e, axis=1, keepdims=True)
        w = e * pl.reciprocal(denom, approx=False)                                     # [B, S, H]
        w_hd = jnp.dot(w.reshape(B * S, H), expand,
                       preferred_element_type=jnp.float32)                             # [B*S, HD]
        fused = jnp.sum((w_hd * v).reshape(B, S, HD), axis=1)                          # [B, HD]

        # --- out_proj (lane-padded to Dp >= 128 -> unmasked lane-dense store) + bias.
        out_ref[...] = jnp.dot(fused, wo_ref[...],
                               preferred_element_type=jnp.float32) + bias[2:3, :Dp]

    return kernel


def fold_params(params):
    """ONE-TIME repack of the per-head (PyTorch-layout) params into the fused kernel layout.

    Called once at init so the per-call path contains no transpose/reshape/pad glue ops.
    """
    H, Tin, D = params['wq'].shape
    kv_in = params['wk'].shape[1]
    HD = H * D
    Dp = ((max(D, 128) + 127) // 128) * 128            # lane-padded out_proj width
    W = ((max(2 * HD, Dp) + 127) // 128) * 128         # packed bias width
    f32 = jnp.float32

    # Head axis folded into the matmul N dimension (column h*D+d = head h, dim d).
    wq_f = jnp.transpose(params['wq'], (1, 0, 2)).reshape(Tin, HD).astype(f32)
    wk_f = jnp.transpose(params['wk'], (1, 0, 2)).reshape(kv_in, HD)
    wv_f = jnp.transpose(params['wv'], (1, 0, 2)).reshape(kv_in, HD)
    wkv_f = jnp.concatenate([wk_f, wv_f], axis=1).astype(f32)          # [kv_in, 2*HD]

    bias = jnp.zeros((3, W), f32)
    bias = bias.at[0, :HD].set(params['bq'].reshape(HD))
    bias = bias.at[1, :HD].set(params['bk'].reshape(HD))
    bias = bias.at[1, HD:2 * HD].set(params['bv'].reshape(HD))
    bias = bias.at[2, :D].set(params['bo'].reshape(D))

    wo_p = jnp.zeros((HD, Dp), f32).at[:, :D].set(params['wo'])

    return {
        'wq': wq_f, 'wkv': wkv_f, 'bias': bias, 'wo': wo_p,
        'num_heads': H, 'head_dim': D, 'out_dim': D, 'out_dim_padded': Dp,
    }


def multi_head_cross_attention(text, image, ecg, folded):
    """Per-call hot path: one pallas_call + the final un-padding slice."""
    B, S = image.shape[0], image.shape[1]
    H, D = folded['num_heads'], folded['head_dim']
    Dp = folded['out_dim_padded']
    HD = H * D
    Tin = text.shape[-1]
    kv_in = image.shape[-1] + ecg.shape[-1]
    inv_scale = 1.0 / math.sqrt(float(D))

    flops = (2 * B * Tin * HD                    # Q projection
             + 2 * B * S * kv_in * 2 * HD        # fused K/V projection
             + 2 * B * S * HD * H                # segmented score reduce (indicator dot)
             + 2 * B * S * H * HD                # softmax-weight lane expansion (indicator dot)
             + 3 * B * S * HD                    # q*k product, w*v product, S-sum
             + 2 * B * HD * Dp)                  # out_proj
    bytes_accessed = 4 * (text.size + image.size + ecg.size
                          + folded['wq'].size + folded['wkv'].size
                          + folded['bias'].size + folded['wo'].size + B * Dp)

    out_padded = pl.pallas_call(
        make_fused_kernel(H, D, inv_scale),
        out_shape=jax.ShapeDtypeStruct((B, Dp), jnp.float32),
        cost_estimate=pl.CostEstimate(flops=flops,
                                      transcendentals=B * S * H,
                                      bytes_accessed=bytes_accessed),
    )(text, image, ecg, folded['wq'], folded['wkv'], folded['bias'], folded['wo'])

    return out_padded[:, :folded['out_dim']]


def reference(text, image, ecg, params):
    """Pure-JAX reference mirroring the PyTorch forward pass."""
    H, Tin, D = params['wq'].shape
    kv = jnp.concatenate([image, ecg], axis=-1)
    scale = jnp.sqrt(jnp.float32(D))
    heads = []
    for h in range(H):
        q = text @ params['wq'][h] + params['bq'][h, 0]                 # [B,1,D]
        k = kv @ params['wk'][h] + params['bk'][h, 0]                   # [B,S,D]
        v = kv @ params['wv'][h] + params['bv'][h, 0]                   # [B,S,D]
        scores = jnp.einsum('bqd,bsd->bqs', q, k) / scale
        w = jax.nn.softmax(scores, axis=-1)
        fused = jnp.einsum('bqs,bsd->bqd', w, v)[:, 0, :]               # squeeze(1)
        heads.append(fused)
    concatenated = jnp.concatenate(heads, axis=-1)
    return concatenated @ params['wo'] + params['bo']


def init_params(key, text_hidden, image_hidden, ecg_hidden, num_heads, hidden_dim):
    kv_in = image_hidden + ecg_hidden
    ks = jax.random.split(key, 8)

    def lin(k, fan_in, shape):
        bound = 1.0 / math.sqrt(fan_in)
        return jax.random.uniform(k, shape, jnp.float32, -bound, bound)

    return {
        'wq': lin(ks[0], text_hidden, (num_heads, text_hidden, hidden_dim)),
        'bq': lin(ks[1], text_hidden, (num_heads, 1, hidden_dim)),
        'wk': lin(ks[2], kv_in, (num_heads, kv_in, hidden_dim)),
        'bk': lin(ks[3], kv_in, (num_heads, 1, hidden_dim)),
        'wv': lin(ks[4], kv_in, (num_heads, kv_in, hidden_dim)),
        'bv': lin(ks[5], kv_in, (num_heads, 1, hidden_dim)),
        'wo': lin(ks[6], num_heads * hidden_dim, (num_heads * hidden_dim, hidden_dim)),
        'bo': lin(ks[7], num_heads * hidden_dim, (1, hidden_dim)),
    }


if __name__ == "__main__":
    B, S = 2, 8
    text_hidden, image_hidden, ecg_hidden = 16, 12, 20
    num_heads, hidden_dim = 2, 32

    key = jax.random.PRNGKey(0)
    k_t, k_i, k_e, k_p = jax.random.split(key, 4)

    text = jax.random.normal(k_t, (B, 1, text_hidden), jnp.float32)
    image = jax.random.normal(k_i, (B, S, image_hidden), jnp.float32)
    ecg = jax.random.normal(k_e, (B, S, ecg_hidden), jnp.float32)
    params = init_params(k_p, text_hidden, image_hidden, ecg_hidden, num_heads, hidden_dim)

    # One-time parameter folding (init-time; NOT on the per-call path).
    folded = fold_params(params)

    out = multi_head_cross_attention(text, image, ecg, folded)
    out = jax.block_until_ready(out)

    ref = jax.block_until_ready(reference(text, image, ecg, params))
    assert out.shape == (B, hidden_dim), out.shape
    assert jnp.allclose(out, ref, rtol=1e-5, atol=1e-5), "mismatch vs reference"

    print("KERNEL_OK")
</pallas_src>

<mosaic_0001>
module attributes {stable_mosaic.version = 11 : i64} {
  func.func @kernel(%arg0: memref<2x1x16xf32, #tpu.memory_space<vmem>>, %arg1: memref<2x8x12xf32, #tpu.memory_space<vmem>>, %arg2: memref<2x8x20xf32, #tpu.memory_space<vmem>>, %arg3: memref<16x64xf32, #tpu.memory_space<vmem>>, %arg4: memref<32x128xf32, #tpu.memory_space<vmem>>, %arg5: memref<3x128xf32, #tpu.memory_space<vmem>>, %arg6: memref<64x128xf32, #tpu.memory_space<vmem>>, %arg7: memref<2x128xf32, #tpu.memory_space<vmem>>) attributes {dimension_semantics = [], scalar_prefetch = 0 : i64, scratch_operands = 0 : i64, tpu.core_type = #tpu.core_type<tc>} {
    %c0 = arith.constant 0 : index
    %c0_0 = arith.constant 0 : index
    %c0_1 = arith.constant 0 : index
    %0 = vector.load %arg0[%c0, %c0_0, %c0_1] : memref<2x1x16xf32, #tpu.memory_space<vmem>>, vector<2x1x16xf32>
    %1 = vector.shape_cast %0 : vector<2x1x16xf32> to vector<2x16xf32>
    %c0_2 = arith.constant 0 : index
    %c0_3 = arith.constant 0 : index
    %c0_4 = arith.constant 0 : index
    %2 = vector.load %arg1[%c0_2, %c0_3, %c0_4] : memref<2x8x12xf32, #tpu.memory_space<vmem>>, vector<2x8x12xf32>
    %3 = vector.shape_cast %2 : vector<2x8x12xf32> to vector<16x12xf32>
    %c0_5 = arith.constant 0 : index
    %c0_6 = arith.constant 0 : index
    %c0_7 = arith.constant 0 : index
    %4 = vector.load %arg2[%c0_5, %c0_6, %c0_7] : memref<2x8x20xf32, #tpu.memory_space<vmem>>, vector<2x8x20xf32>
    %5 = vector.shape_cast %4 : vector<2x8x20xf32> to vector<16x20xf32>
    %c0_8 = arith.constant 0 : index
    %c0_9 = arith.constant 0 : index
    %6 = vector.load %arg5[%c0_8, %c0_9] : memref<3x128xf32, #tpu.memory_space<vmem>>, vector<3x128xf32>
    %7 = tpu.concatenate %3, %5 in 1 : vector<16x12xf32>, vector<16x20xf32> -> vector<16x32xf32>
    %c0_10 = arith.constant 0 : index
    %c0_11 = arith.constant 0 : index
    %8 = vector.load %arg3[%c0_10, %c0_11] : memref<16x64xf32, #tpu.memory_space<vmem>>, vector<16x64xf32>
    %cst = arith.constant dense<0.000000e+00> : vector<2x64xf32>
    %9 = tpu.matmul %1, %8, %cst {dimension_numbers = #tpu.dot_dimension_numbers<[1], [0], [0], [1], [0, 0, 1, 1], [], []>} : vector<2x16xf32>, vector<16x64xf32>, vector<2x64xf32> -> vector<2x64xf32>
    %10 = vector.extract_strided_slice %6 {offsets = [0, 0], sizes = [1, 64], strides = [1, 1]} : vector<3x128xf32> to vector<1x64xf32>
    %11 = vector.broadcast %10 : vector<1x64xf32> to vector<2x64xf32>
    %12 = arith.addf %9, %11 : vector<2x64xf32>
    %c0_12 = arith.constant 0 : index
    %c0_13 = arith.constant 0 : index
    %13 = vector.load %arg4[%c0_12, %c0_13] : memref<32x128xf32, #tpu.memory_space<vmem>>, vector<32x128xf32>
    %cst_14 = arith.constant dense<0.000000e+00> : vector<16x128xf32>
    %14 = tpu.matmul %7, %13, %cst_14 {dimension_numbers = #tpu.dot_dimension_numbers<[1], [0], [0], [1], [0, 0, 1, 1], [], []>} : vector<16x32xf32>, vector<32x128xf32>, vector<16x128xf32> -> vector<16x128xf32>
    %15 = vector.extract_strided_slice %6 {offsets = [1, 0], sizes = [1, 128], strides = [1, 1]} : vector<3x128xf32> to vector<1x128xf32>
    %16 = vector.broadcast %15 : vector<1x128xf32> to vector<16x128xf32>
    %17 = arith.addf %14, %16 : vector<16x128xf32>
    %18 = vector.extract_strided_slice %17 {offsets = [0, 0], sizes = [16, 64], strides = [1, 1]} : vector<16x128xf32> to vector<16x64xf32>
    %19 = vector.shape_cast %18 : vector<16x64xf32> to vector<2x8x64xf32>
    %20 = vector.extract_strided_slice %17 {offsets = [0, 64], sizes = [16, 64], strides = [1, 1]} : vector<16x128xf32> to vector<16x64xf32>
    %21 = tpu.iota {dimensions = array<i32: 0>} : vector<64x2xi32>
    %22 = tpu.iota {dimensions = array<i32: 1>} : vector<64x2xi32>
    %c32_i32 = arith.constant 32 : i32
    %23 = vector.broadcast %c32_i32 : i32 to vector<64x2xi32>
    %24 = arith.muli %22, %23 : vector<64x2xi32>
    %25 = arith.cmpi sge, %21, %24 : vector<64x2xi32>
    %c32_i32_15 = arith.constant 32 : i32
    %26 = vector.broadcast %c32_i32_15 : i32 to vector<64x2xi32>
    %27 = arith.addi %24, %26 : vector<64x2xi32>
    %28 = arith.cmpi slt, %21, %27 : vector<64x2xi32>
    %29 = arith.andi %25, %28 : vector<64x2xi1>
    %cst_16 = arith.constant 1.000000e+00 : f32
    %cst_17 = arith.constant 0.000000e+00 : f32
    %30 = vector.broadcast %cst_16 : f32 to vector<64x2xf32>
    %31 = vector.broadcast %cst_17 : f32 to vector<64x2xf32>
    %32 = arith.select %29, %30, %31 : vector<64x2xi1>, vector<64x2xf32>
    %33 = tpu.iota {dimensions = array<i32: 0>} : vector<2x64xi32>
    %c32_i32_18 = arith.constant 32 : i32
    %34 = vector.broadcast %c32_i32_18 : i32 to vector<2x64xi32>
    %35 = arith.muli %33, %34 : vector<2x64xi32>
    %36 = tpu.iota {dimensions = array<i32: 1>} : vector<2x64xi32>
    %37 = arith.cmpi sge, %36, %35 : vector<2x64xi32>
    %c32_i32_19 = arith.constant 32 : i32
    %38 = vector.broadcast %c32_i32_19 : i32 to vector<2x64xi32>
    %39 = arith.addi %35, %38 : vector<2x64xi32>
    %40 = arith.cmpi slt, %36, %39 : vector<2x64xi32>
    %41 = arith.andi %37, %40 : vector<2x64xi1>
    %cst_20 = arith.constant 1.000000e+00 : f32
    %cst_21 = arith.constant 0.000000e+00 : f32
    %42 = vector.broadcast %cst_20 : f32 to vector<2x64xf32>
    %43 = vector.broadcast %cst_21 : f32 to vector<2x64xf32>
    %44 = arith.select %41, %42, %43 : vector<2x64xi1>, vector<2x64xf32>
    %45 = vector.shape_cast %12 : vector<2x64xf32> to vector<2x1x64xf32>
    %46 = vector.broadcast %45 : vector<2x1x64xf32> to vector<2x8x64xf32>
    %47 = arith.mulf %46, %19 : vector<2x8x64xf32>
    %48 = vector.shape_cast %47 : vector<2x8x64xf32> to vector<16x64xf32>
    %cst_22 = arith.constant dense<0.000000e+00> : vector<16x2xf32>
    %49 = tpu.matmul %48, %32, %cst_22 {dimension_numbers = #tpu.dot_dimension_numbers<[1], [0], [0], [1], [0, 0, 1, 1], [], []>} : vector<16x64xf32>, vector<64x2xf32>, vector<16x2xf32> -> vector<16x2xf32>
    %cst_23 = arith.constant 0.176776692 : f32
    %50 = vector.broadcast %cst_23 : f32 to vector<16x2xf32>
    %51 = arith.mulf %49, %50 : vector<16x2xf32>
    %52 = vector.shape_cast %51 : vector<16x2xf32> to vector<2x8x2xf32>
    %cst_24 = arith.constant dense<0xFF800000> : vector<2x2xf32>
    %53 = vector.multi_reduction <maximumf>, %52, %cst_24 [1] : vector<2x8x2xf32> to vector<2x2xf32>
    %54 = vector.shape_cast %53 : vector<2x2xf32> to vector<2x1x2xf32>
    %55 = vector.broadcast %54 : vector<2x1x2xf32> to vector<2x8x2xf32>
    %56 = arith.subf %52, %55 : vector<2x8x2xf32>
    %57 = math.exp %56 : vector<2x8x2xf32>
    %cst_25 = arith.constant dense<0.000000e+00> : vector<2x2xf32>
    %58 = vector.multi_reduction <add>, %57, %cst_25 [1] : vector<2x8x2xf32> to vector<2x2xf32>
    %59 = vector.shape_cast %58 : vector<2x2xf32> to vector<2x1x2xf32>
    %60 = tpu.reciprocal %59 : vector<2x1x2xf32> -> vector<2x1x2xf32>
    %61 = vector.broadcast %60 : vector<2x1x2xf32> to vector<2x8x2xf32>
    %62 = arith.mulf %57, %61 : vector<2x8x2xf32>
    %63 = vector.shape_cast %62 : vector<2x8x2xf32> to vector<16x2xf32>
    %cst_26 = arith.constant dense<0.000000e+00> : vector<16x64xf32>
    %64 = tpu.matmul %63, %44, %cst_26 {dimension_numbers = #tpu.dot_dimension_numbers<[1], [0], [0], [1], [0, 0, 1, 1], [], []>} : vector<16x2xf32>, vector<2x64xf32>, vector<16x64xf32> -> vector<16x64xf32>
    %65 = arith.mulf %64, %20 : vector<16x64xf32>
    %66 = vector.shape_cast %65 : vector<16x64xf32> to vector<2x8x64xf32>
    %cst_27 = arith.constant dense<0.000000e+00> : vector<2x64xf32>
    %67 = vector.multi_reduction <add>, %66, %cst_27 [1] : vector<2x8x64xf32> to vector<2x64xf32>
    %c0_28 = arith.constant 0 : index
    %c0_29 = arith.constant 0 : index
    %68 = vector.load %arg6[%c0_28, %c0_29] : memref<64x128xf32, #tpu.memory_space<vmem>>, vector<64x128xf32>
    %cst_30 = arith.constant dense<0.000000e+00> : vector<2x128xf32>
    %69 = tpu.matmul %67, %68, %cst_30 {dimension_numbers = #tpu.dot_dimension_numbers<[1], [0], [0], [1], [0, 0, 1, 1], [], []>} : vector<2x64xf32>, vector<64x128xf32>, vector<2x128xf32> -> vector<2x128xf32>
    %70 = vector.extract_strided_slice %6 {offsets = [2, 0], sizes = [1, 128], strides = [1, 1]} : vector<3x128xf32> to vector<1x128xf32>
    %71 = vector.broadcast %70 : vector<1x128xf32> to vector<2x128xf32>
    %72 = arith.addf %69, %71 : vector<2x128xf32>
    %c0_31 = arith.constant 0 : index
    %c0_32 = arith.constant 0 : index
    %73 = vector.load %arg7[%c0_31, %c0_32] : memref<2x128xf32, #tpu.memory_space<vmem>>, vector<2x128xf32>
    tpu.vector_store %arg7[%c0_31, %c0_32], %72 {strides = array<i32>} : memref<2x128xf32, #tpu.memory_space<vmem>>, vector<2x128xf32>,
    return
  }
}

</mosaic_0001>

<bundles_post_ra>
// kernel: tpu_custom_call.1
= control target key start
LH: loop header
LB: loop body
LE: loop exit
PB: predicated region body
PF: predicated region fallthrough
CT: control target
= control target key end

     0   :  { %12 = vsyncpa [#allocation3], 0  ;;  %s1177_s0 = inlined_call_operand.hbm [shape: f32[2,1,16], index: 0, kind: input, shape index: {}]   ;;  %s1178_s1 = inlined_call_operand.hbm [shape: f32[2,8,12], index: 1, kind: input, shape index: {}]   ;;  %s1179_s2 = inlined_call_operand.hbm [shape: f32[2,8,20], index: 2, kind: input, shape index: {}]   ;;  %s1180_s3 = inlined_call_operand.hbm [shape: f32[16,64], index: 3, kind: input, shape index: {}]   ;;  %s1181_s4 = inlined_call_operand.hbm [shape: f32[32,128], index: 4, kind: input, shape index: {}]   ;;  %s1182_s5 = inlined_call_operand.vmem [shape: f32[3,128], index: 5, kind: input, shape index: {}]   ;;  %s1183_s6 = inlined_call_operand.hbm [shape: f32[64,128], index: 6, kind: input, shape index: {}]   ;;  %s1184_s7 = inlined_call_operand.hbm [shape: f32[2,128], index: 7, kind: output, shape index: {}]  }
   0x1   :  { %13 = vsyncpa [#allocation6], 0 }
   0x2   :  { %14 = vsyncpa [#allocation9], 0 }
   0x3   :  { %15 = vsyncpa [#allocation12], 0 }
   0x4   :  { %16 = vsyncpa [#allocation4], 0  ;;  %s1022_s24 = smov [#allocation5]  }
   0x5   :  { %s34_s25 = sshll.u32 %s1022_s24, 4  ;;  %s35_s25 = int_to_ptr.vmem [resolvable:$true] %s34_s25 }
   0x6   :  { %s880_s26 = scalar_lea.vmem %s35_s25, 256  ;;  %p885_p1 = scmp.lt.s32.totalorder %s35_s25, %s35_s25 }
   0x7   :  { %p881_p0 = scmp.ne.s32.totalorder %s35_s25, %s880_s26  ;;  %p886_p2 = scmp.lt.s32.totalorder %s880_s26, %s880_s26 }
   0x9   :  { %p887_p3 = por %p886_p2, %p885_p1 }
   0xb   :  { %p888_p4 = pnand %p887_p3, %p881_p0 }
   0xd   :  { %891 = shalt.err (!%p888_p4)
}
   0xe   :  { %s1023_s27 = smov 128   ;;  %s1024_s28 = smov 8  }
   0xf   :  { %40 = dma.hbm_to_vmem [thread:$0]  %s1178_s1, 256, %s35_s25, [#allocation6], %s1023_s27, %s1023_s27, %s1024_s28  }
  0x10   :  { %s1025_s8 = smov [#allocation8]   ;;  %s1026_s10 = smov [#allocation2]  }
  0x11   :  { %s58_s9 = sshll.u32 %s1025_s8, 4  ;;  %s22_s11 = sshll.u32 %s1026_s10, 4  ;;  %s59_s9 = int_to_ptr.vmem [resolvable:$true] %s58_s9  ;;  %s23_s11 = int_to_ptr.vmem [resolvable:$true] %s22_s11 }
  0x12   :  { %s900_s12 = scalar_lea.vmem %s59_s9, 256  ;;  %p905_p6 = scmp.lt.s32.totalorder %s59_s9, %s59_s9 }
  0x13   :  { %p901_p5 = scmp.ne.s32.totalorder %s59_s9, %s900_s12  ;;  %p906_p7 = scmp.lt.s32.totalorder %s900_s12, %s900_s12 }
  0x15   :  { %p907_p8 = por %p906_p7, %p905_p6 }
  0x17   :  { %p908_p9 = pnand %p907_p8, %p901_p5 }
  0x19   :  { %911 = shalt.err (!%p908_p9)
}
  0x1a   :  { %64 = dma.hbm_to_vmem [thread:$0]  %s1180_s3, 256, %s59_s9, [#allocation9], %s1023_s27, %s1023_s27, %s1024_s28  }
  0x1b   :  { %s920_s1 = scalar_lea.vmem %s23_s11, 32  ;;  %p925_p11 = scmp.lt.s32.totalorder %s23_s11, %s23_s11 }
  0x1c   :  { %p921_p10 = scmp.ne.s32.totalorder %s23_s11, %s920_s1  ;;  %p926_p12 = scmp.lt.s32.totalorder %s920_s1, %s920_s1 }
  0x1e   :  { %p927_p13 = por %p926_p12, %p925_p11 }
  0x20   :  { %p928_p0 = pnand %p927_p13, %p921_p10 }
  0x22   :  { %931 = shalt.err (!%p928_p0)
}
  0x23   :  { %s1027_s15 = smov 16   ;;  %s1028_s16 = smov 1  }
  0x24   :  { %28 = dma.hbm_to_vmem [thread:$0]  %s1177_s0, 32, %s23_s11, [#allocation3], %s1027_s15, %s1027_s15, %s1028_s16  }
  0x25   :  { %s1029_s19 = smov [#allocation7]   ;;  %s1030_s21 = smov [#allocation10]  }
  0x26   :  { %s46_s20 = sshll.u32 %s1029_s19, 4  ;;  %s70_s22 = sshll.u32 %s1030_s21, 4  ;;  %s47_s20 = int_to_ptr.vmem [resolvable:$true] %s46_s20  ;;  %s71_s22 = int_to_ptr.vmem [resolvable:$true] %s70_s22 }
  0x27   :  { %s940_s3 = scalar_lea.vmem %s47_s20, 256  ;;  %p945_p2 = scmp.lt.s32.totalorder %s47_s20, %s47_s20 }
  0x28   :  { %p941_p1 = scmp.ne.s32.totalorder %s47_s20, %s940_s3  ;;  %p946_p3 = scmp.lt.s32.totalorder %s940_s3, %s940_s3 }
  0x2a   :  { %p947_p4 = por %p946_p3, %p945_p2 }
  0x2c   :  { %p948_p5 = pnand %p947_p4, %p941_p1 }
  0x2e   :  { %951 = shalt.err (!%p948_p5)
}
  0x2f   :  { %52 = dma.hbm_to_vmem [thread:$0]  %s1179_s2, 256, %s47_s20, [#allocation6], %s1023_s27, %s1023_s27, %s1024_s28  }
  0x30   :  { %s960_s0 = scalar_lea.vmem %s71_s22, 512  ;;  %p965_p7 = scmp.lt.s32.totalorder %s71_s22, %s71_s22 }
  0x31   :  { %p961_p6 = scmp.ne.s32.totalorder %s71_s22, %s960_s0  ;;  %p966_p8 = scmp.lt.s32.totalorder %s960_s0, %s960_s0 }
  0x33   :  { %p967_p9 = por %p966_p8, %p965_p7 }
  0x35   :  { %p968_p10 = pnand %p967_p9, %p961_p6 }
  0x37   :  { %971 = shalt.err (!%p968_p10)
}
  0x38   :  { %76 = dma.hbm_to_vmem [thread:$0]  %s1181_s4, 512, %s71_s22, [#allocation9], %s1023_s27, %s1023_s27, %s1024_s28  }
  0x39   :  { %s1031_s29 = smov [#allocation11]  }
  0x3a   :  { %s84_s30 = sshll.u32 %s1031_s29, 4  ;;  %s85_s30 = int_to_ptr.vmem [resolvable:$true] %s84_s30 }
  0x3b   :  { %s980_s8 = scalar_lea.vmem %s85_s30, 1024  ;;  %p985_p12 = scmp.lt.s32.totalorder %s85_s30, %s85_s30 }
  0x3c   :  { %p981_p11 = scmp.ne.s32.totalorder %s85_s30, %s980_s8  ;;  %p986_p13 = scmp.lt.s32.totalorder %s980_s8, %s980_s8 }
  0x3e   :  { %p987_p0 = por %p986_p13, %p985_p12 }
  0x40   :  { %p988_p1 = pnand %p987_p0, %p981_p11 }
  0x42   :  { %991 = shalt.err (!%p988_p1)
}
  0x43   :  { %90 = dma.hbm_to_vmem [thread:$0]  %s1183_s6, 1024, %s85_s30, [#allocation12], %s1023_s27, %s1023_s27, %s1024_s28  }
  0x44   :  { %1012 = dma.done.wait [#allocation3], 32  }
  0x45   :  { %1013 = vsyncadd [#allocation3], 4294967264 }
  0x46   :  { %1014 = dma.done.wait [#allocation6], 512  }
  0x47   :  { %1015 = vsyncadd [#allocation6], 4294966784 }
  0x48   :  { %1016 = dma.done.wait [#allocation9], 768  }
  0x49   :  { %1017 = vsyncadd [#allocation9], 4294966528 }
  0x4a   :  { %1018 = dma.done.wait [#allocation12], 1024  }
  0x4b   :  { %1019 = vsyncadd [#allocation12], 4294966272  ;;  %v129_v0 = vlaneseq  ;;  %v1032_v1 = vmov 0.0   ;;  %vm1033_vm0 = vmmov 0   ;;  %v1034_v2 = vmov 1966171168  }
  0x4c   :  { %786 = vmatprep.subr.mxu0 %v1032_v1  ;;  %790 = vmatprep.mubr.msk.f32.mxu0 %vm1033_vm0, %v1032_v1  ;;  %v137_v3 = vunpack.c.l.s4 %v1034_v2  ;;  %v113_v6 = vld [vmem:[#allocation7] sm:$0xff]  ;;  %v128_v7 = vld [vmem:[#allocation8 + $0x8] sm:$0xff]  ;;  %s1035_s4 = smov 12   ;;  %v127_v9 = vld [vmem:[#allocation8] sm:$0xff]  ;;  %vm150_vm1 = vcmask 130048   ;;  %v1036_v27 = vmov 1.0  }
  0x4d   :  { %v1115_v4 = vshrl.u32 %v129_v0, 7  ;;  %118 = vrot.lane.b32.xlu0 %v113_v6, %s1035_s4  ;;  %787 = vmatpush3.msra.mxu0 %v128_v7  ;;  %v109_v10 = vld [vmem:[#allocation2] sm:$0x1]  ;;  %v110_v11 = vld [vmem:[#allocation2 + $0x1] sm:$0x1]  ;;  %v226_v14 = vld [vmem:[#allocation10 + $0x18] sm:$0xff] }
  0x4e   :  { %v138_v5 = vunpack.c.0.s8 %v137_v3  ;;  %v114_v12 = vld [vmem:[#allocation7 + $0x8] sm:$0xff]  ;;  %788 = vmatprep.subr.mxu0 %v1032_v1  ;;  %v135_v13 = vcombine.low %v109_v10, %v110_v11  ;;  %v225_v15 = vld [vmem:[#allocation10 + $0x10] sm:$0xff]  ;;  %793 = vmatprep.subr.mxu1 %v226_v14  ;;  %v223_v19 = vld [vmem:[#allocation10] sm:$0xff]  ;;  %v1125_v21 = vand.u32 127, %v129_v0  ;;  %vm124_vm14 = vcmask 97280   ;;  %s1038_s28 = smov [#allocation13]  }
  0x4f   :  { %789 = vmatpush3.msra.mxu0 %v127_v9  ;;  %794 = vmatpush3.msra.mxu1 %v226_v14  ;;  %v224_v17 = vld [vmem:[#allocation10 + $0x8] sm:$0xff]  ;;  %v321_v20 = vadd.s32 56, %v1115_v4  ;;  %v320_v22 = vadd.s32 48, %v1115_v4  ;;  %v319_v24 = vadd.s32 40, %v1115_v4  ;;  %v318_v26 = vadd.s32 32, %v1115_v4  ;;  %v111_v28 = vld [vmem:[#allocation5] sm:$0xff] }
  0x50   :  { %v1118_v8 = vsub.s32 %v138_v5, %v1115_v4  ;;  %795 = vmatprep.subr.mxu1 %v225_v15  ;;  %v324_v23 = vmul.u32 32, %v1125_v21  ;;  %vm231_vm15 = vcmask 261120   ;;  %v112_v31 = vld [vmem:[#allocation5 + $0x8] sm:$0xff]  ;;  %v317_v34 = vadd.s32 24, %v1115_v4  ;;  %v1142_v40 = vld [vmem:[%s1182_s5] sm:$0x7] }
  0x51   :  { %120 = vrot.lane.b32.xlu0 %v114_v12, %s1035_s4  ;;  %796 = vmatpush3.msra.mxu1 %v225_v15  ;;  %v316_v35 = vadd.s32 16, %v1115_v4  ;;  %v315_v36 = vadd.s32 8, %v1115_v4  ;;  %v131_v39 = vsub.s32 0, %v1115_v4  ;;  %v229_v45 = vsub.s32 1, %v1115_v4  ;;  %s1037_s5 = smov 64   ;;  %s726_s10 = sshll.u32 %s1038_s28, 4  ;;  %s727_s10 = int_to_ptr.vmem [resolvable:$true] %s726_s10 }
  0x52   :  { %v142_v16 = vrot.slane %v135_v13, %v1118_v8  ;;  %797 = vmatprep.subr.mxu1 %v224_v17  ;;  %vm332_vm2 = vcmp.ge.s32.totalorder %v321_v20, %v324_v23  ;;  %v333_v25 = vadd.s32 32, %v324_v23  ;;  %vm331_vm3 = vcmp.ge.s32.totalorder %v320_v22, %v324_v23  ;;  %s992_s11 = scalar_lea.vmem %s727_s10, 32  ;;  %p997_p3 = scmp.lt.s32.totalorder %s727_s10, %s727_s10 }
  0x53   :  { %798 = vmatpush3.msra.mxu1 %v224_v17  ;;  %vm330_vm6 = vcmp.ge.s32.totalorder %v319_v24, %v324_v23  ;;  %vm329_vm10 = vcmp.ge.s32.totalorder %v318_v26, %v324_v23  ;;  %v132_v41 = vrot.slane %v1142_v40, %v131_v39  ;;  %v230_v47 = vrot.slane %v1142_v40, %v229_v45  ;;  %v634_v45 = vld [vmem:[#allocation11 + $0x18] sm:$0xff]  ;;  %p993_p2 = scmp.ne.s32.totalorder %s727_s10, %s992_s11  ;;  %p998_p4 = scmp.lt.s32.totalorder %s992_s11, %s992_s11 }
  0x54   :  { %v149_v18 = vrot.slane %v142_v16, %v1118_v8  ;;  %799 = vmatprep.subr.mxu1 %v223_v19  ;;  %vm341_vm4 = vcmp.lt.s32.totalorder %v321_v20, %v333_v25  ;;  %vm340_vm5 = vcmp.lt.s32.totalorder %v320_v22, %v333_v25  ;;  %vm339_vm7 = vcmp.lt.s32.totalorder %v319_v24, %v333_v25 }
  0x55   :  { %800 = vmatpush3.msra.mxu1 %v223_v19  ;;  %vm349_vm8 = vmand %vm332_vm2, %vm341_vm4  ;;  %vm338_vm11 = vcmp.lt.s32.totalorder %v318_v26, %v333_v25  ;;  %vm337_vm2 = vcmp.lt.s32.totalorder %v317_v34, %v333_v25  ;;  %vm327_vm4 = vcmp.ge.s32.totalorder %v316_v35, %v324_v23  ;;  %v358_v57 = vmul.u32 32, %v1115_v4  ;;  %p999_p5 = por %p998_p4, %p997_p3 }
  0x56   :  { %791 = vmatmul.mubr.msk.f32.vlgmr.msra.gmra.mxu0 %vm150_vm1, %v149_v18  ;;  %828 = vmatprep.subr.mxu1 %v1032_v1  ;;  %vm348_vm9 = vmand %vm331_vm3, %vm340_vm5  ;;  %vm328_vm1 = vcmp.ge.s32.totalorder %v317_v34, %v324_v23  ;;  %vm336_vm5 = vcmp.lt.s32.totalorder %v316_v35, %v333_v25 }
  0x57   :  { %804 = vmatprep.subr.msk.mxu0 %vm349_vm8, %v1036_v27  ;;  %vm347_vm12 = vmand %vm330_vm6, %vm339_vm7  ;;  %vm326_vm7 = vcmp.ge.s32.totalorder %v315_v36, %v324_v23  ;;  %v360_v58 = vadd.s32 32, %v358_v57  ;;  %p1000_p6 = pnand %p999_p5, %p993_p2 }
  0x58   :  { %805 = vmatpush3.msk.msra.mxu0 %vm349_vm8, %v1036_v27  ;;  %vm346_vm13 = vmand %vm329_vm10, %vm338_vm11  ;;  %vm335_vm8 = vcmp.lt.s32.totalorder %v315_v36, %v333_v25  ;;  %vm334_vm10 = vcmp.lt.s32.totalorder %v1115_v4, %v333_v25 }
  0x59   :  { %806 = vmatprep.subr.msk.mxu0 %vm348_vm9, %v1036_v27  ;;  %vm345_vm3 = vmand %vm328_vm1, %vm337_vm2  ;;  %vm483_vm2 = vcmask 15360  }
  0x5a   :  { %807 = vmatpush3.msk.msra.mxu0 %vm348_vm9, %v1036_v27  ;;  %vm344_vm6 = vmand %vm327_vm4, %vm336_vm5 }
  0x5b   :  { %808 = vmatprep.subr.msk.mxu0 %vm347_vm12, %v1036_v27  ;;  %vm343_vm9 = vmand %vm326_vm7, %vm335_vm8 }
  0x5c   :  { %809 = vmatpush3.msk.msra.mxu0 %vm347_vm12, %v1036_v27  ;;  %vm399_vm12 = vcmask 523264  }
  0x5d   :  { %810 = vmatprep.subr.msk.mxu0 %vm346_vm13, %v1036_v27 }
  0x5e   :  { %811 = vmatpush3.msk.msra.mxu0 %vm346_vm13, %v1036_v27  ;;  %vm359_vm13 = vcmp.ge.s32.totalorder %v1125_v21, %v358_v57 }
  0x5f   :  { %812 = vmatprep.subr.msk.mxu0 %vm345_vm3, %v1036_v27 }
  0x60   :  { %813 = vmatpush3.msk.msra.mxu0 %vm345_vm3, %v1036_v27  ;;  %vm645_vm3 = vcmask 1041409  }
  0x61   :  { %814 = vmatprep.subr.msk.mxu0 %vm344_vm6, %v1036_v27 }
  0x62   :  { %815 = vmatpush3.msk.msra.mxu0 %vm344_vm6, %v1036_v27 }
  0x63   :  { %816 = vmatprep.subr.msk.mxu0 %vm343_vm9, %v1036_v27 }
  0x64   :  { %817 = vmatpush3.msk.msra.mxu0 %vm343_vm9, %v1036_v27 }
  0xbf   :  { %v119_v29 = vpop.permute.xlu0 %118 }
  0xc0   :  { %v125_v30 = vsel %vm124_vm14, %v111_v28, %v119_v29 }
  0xc1   :  { %801 = vmatprep.mubr.msk.f32.mxu1 %vm231_vm15, %v125_v30 }
  0xc3   :  { %v121_v32 = vpop.permute.xlu0 %120 }
  0xc4   :  { %v126_v33 = vsel %vm124_vm14, %v112_v31, %v121_v32  ;;  %vm361_vm14 = vcmp.lt.s32.totalorder %v1125_v21, %v360_v58 }
  0xc5   :  { %802 = vmatmul.mubr.msk.f32.vlgmr.msra.gmra.mxu1 %vm231_vm15, %v126_v33  ;;  %vm528_vm15 = vcmask 1041408   ;;  %vm362_vm1 = vmand %vm359_vm13, %vm361_vm14 }
  0xc6   :  { %844 = vmatprep.mubr.msk.f32.mxu1 %vm1033_vm0, %v1032_v1  ;;  %vm325_vm0 = vcmp.ge.s32.totalorder %v1115_v4, %v324_v23  ;;  %v363_v59 = vsel %vm362_vm1, 1.0, %v1032_v1 }
  0xc7   :  { %vm342_vm11 = vmand %vm325_vm0, %vm334_vm10 }
  0xc8   :  { %818 = vmatprep.subr.msk.mxu0 %vm342_vm11, %v1036_v27 }
  0xc9   :  { %819 = vmatpush3.msk.msra.mxu0 %vm342_vm11, %v1036_v27 }
  0xca   :  { %823 = vmatprep.subr.msk.mxu0 %vm528_vm15, %v363_v59 }
 0x116   :  { %v219_v37 = vpop.f32.mrf.mxu0 }
 0x117   :  { %v220_v42 = vadd.f32 %v219_v37, %v132_v41  ;;  %v638_v41 = vld [vmem:[#allocation11 + $0x38] sm:$0xff] }
 0x118   :  { %v792_v38 = vpop.f32.mrf.mxu0  ;;  %829 = vmatpush3.msra.mxu1 %v638_v41 }
 0x119   :  { %v371_v43 = vrot.slane %v220_v42, %v1118_v8  ;;  %830 = vmatprep.subr.mxu1 %v1032_v1  ;;  %v637_v42 = vld [vmem:[#allocation11 + $0x30] sm:$0xff] }
 0x11a   :  { %831 = vmatpush3.msra.mxu1 %v637_v42 }
 0x11b   :  { %v372_v44 = vcombine.high %v371_v43, %v371_v43  ;;  %v379_v46 = vrot.slane %v371_v43, %v1118_v8  ;;  %832 = vmatprep.subr.mxu1 %v1032_v1  ;;  %v636_v43 = vld [vmem:[#allocation11 + $0x28] sm:$0xff] }
 0x11c   :  { %833 = vmatpush3.msra.mxu1 %v636_v43 }
 0x11d   :  { %v386_v48 = vrot.slane %v372_v44, %v1118_v8  ;;  %v390_v50 = vrot.slane %v379_v46, %v131_v39  ;;  %834 = vmatprep.subr.mxu1 %v1032_v1  ;;  %v635_v44 = vld [vmem:[#allocation11 + $0x20] sm:$0xff]  ;;  %v633_v46 = vld [vmem:[#allocation11 + $0x10] sm:$0xff] }
 0x11e   :  { %835 = vmatpush3.msra.mxu1 %v635_v44 }
 0x11f   :  { %v394_v52 = vrot.slane %v386_v48, %v131_v39  ;;  %836 = vmatprep.subr.mxu1 %v1032_v1  ;;  %v631_v48 = vld [vmem:[#allocation11] sm:$0xff] }
 0x120   :  { %837 = vmatpush3.msra.mxu1 %v634_v45 }
 0x121   :  { %838 = vmatprep.subr.mxu1 %v1032_v1 }
 0x122   :  { %839 = vmatpush3.msra.mxu1 %v633_v46 }
 0x123   :  { %840 = vmatprep.subr.mxu1 %v1032_v1 }
 0x185   :  { %v803_v49 = vpop.f32.mrf.mxu1 }
 0x186   :  { %v310_v51 = vadd.f32 %v803_v49, %v230_v47 }
 0x187   :  { %v304_v53 = vpop.f32.mrf.mxu1 }
 0x188   :  { %v305_v54 = vadd.f32 %v304_v53, %v230_v47  ;;  %v398_v56 = vmul.f32 %v394_v52, %v310_v51  ;;  %v632_v47 = vld [vmem:[#allocation11 + $0x8] sm:$0xff] }
 0x189   :  { %841 = vmatpush3.msra.mxu1 %v632_v47 }
 0x18a   :  { %v397_v55 = vmul.f32 %v390_v50, %v305_v54  ;;  %609 = vrot.lane.b32.xlu1 %v305_v54, %s1037_s5  ;;  %842 = vmatprep.subr.mxu1 %v1032_v1 }
 0x18b   :  { %843 = vmatpush3.msra.mxu1 %v631_v48 }
 0x18c   :  { %820 = vmatprep.mubr.msk.f32.mxu0 %vm399_vm12, %v397_v55 }
 0x18d   :  { %821 = vmatmul.mubr.msk.f32.vlgmr.msra.gmra.mxu0 %vm399_vm12, %v398_v56 }
 0x18e   :  { %611 = vrot.lane.b32.xlu1 %v310_v51, %s1037_s5  ;;  %824 = vmatpush3.msk.msra.mxu0 %vm528_vm15, %v363_v59 }
 0x1fc   :  { %v610_v49 = vpop.permute.xlu1 %609 }
 0x200   :  { %v612_v50 = vpop.permute.xlu1 %611 }
 0x24d   :  { %v822_v60 = vpop.f32.mrf.mxu0 }
 0x24e   :  { %v482_v61 = vmul.f32 0.17677669, %v822_v60 }
 0x24f   :  { %v472_v62 = vpop.f32.mrf.mxu0 }
 0x250   :  { %v491_v63 = vsel %vm483_vm2, %v482_v61, -inf  ;;  %v481_v0 = vmul.f32 0.17677669, %v472_v62 }
 0x251   :  { %v492_v2 = vrot.slane %v491_v63, 4 }
 0x252   :  { %v484_v3 = vsel %vm483_vm2, %v481_v0, -inf }
 0x253   :  { %v493_v5 = vmax.f32 %v491_v63, %v492_v2  ;;  %v485_v6 = vrot.slane %v484_v3, 4 }
 0x255   :  { %v494_v7 = vrot.slane %v493_v5, 2  ;;  %v486_v8 = vmax.f32 %v484_v3, %v485_v6 }
 0x257   :  { %v495_v9 = vmax.f32 %v493_v5, %v494_v7  ;;  %v487_v10 = vrot.slane %v486_v8, 2  ;;  %v641_v7 = vsub.s32 2, %v1115_v4 }
 0x259   :  { %v496_v11 = vrot.slane %v495_v9, 1  ;;  %v488_v12 = vmax.f32 %v486_v8, %v487_v10  ;;  %v642_v8 = vrot.slane %v1142_v40, %v641_v7 }
 0x25b   :  { %v497_v13 = vmax.f32 %v495_v9, %v496_v11  ;;  %v489_v14 = vrot.slane %v488_v12, 1 }
 0x25d   :  { %v499_v15 = vsub.f32 %v482_v61, %v497_v13  ;;  %v490_v16 = vmax.f32 %v488_v12, %v489_v14 }
 0x25f   :  { %v502_v17 = vmul.f32 1.442695, %v499_v15  ;;  %v498_v18 = vsub.f32 %v481_v0, %v490_v16 }
 0x261   :  { %864 = vpow2.f32 %v502_v17  ;;  %v500_v19 = vmul.f32 1.442695, %v498_v18 }
 0x263   :  { %866 = vpow2.f32 %v500_v19 }
 0x26e   :  { %v865_v20 = vpop.eup %864 }
 0x26f   :  { %v511_v21 = vsel %vm483_vm2, %v865_v20, 0.0 }
 0x270   :  { %v867_v22 = vpop.eup %866  ;;  %v512_v23 = vrot.slane %v511_v21, 4 }
 0x271   :  { %v504_v24 = vsel %vm483_vm2, %v867_v22, 0.0 }
 0x272   :  { %v513_v25 = vadd.f32 %v512_v23, %v511_v21  ;;  %v505_v26 = vrot.slane %v504_v24, 4 }
 0x274   :  { %v514_v27 = vrot.slane %v513_v25, 2  ;;  %v506_v28 = vadd.f32 %v505_v26, %v504_v24 }
 0x276   :  { %v515_v29 = vadd.f32 %v514_v27, %v513_v25  ;;  %v507_v30 = vrot.slane %v506_v28, 2 }
 0x278   :  { %v516_v31 = vrot.slane %v515_v29, 1  ;;  %v508_v32 = vadd.f32 %v507_v30, %v506_v28 }
 0x27a   :  { %v517_v33 = vadd.f32 %v516_v31, %v515_v29  ;;  %v509_v34 = vrot.slane %v508_v32, 1 }
 0x27c   :  { %v510_v35 = vadd.f32 %v509_v34, %v508_v32  ;;  %868 = vrcp.f32 %v517_v33 }
 0x27e   :  { %870 = vrcp.f32 %v510_v35 }
 0x289   :  { %v869_v36 = vpop.eup %868 }
 0x28a   :  { %v521_v39 = vmul.f32 %v869_v36, %v865_v20 }
 0x28b   :  { %v871_v37 = vpop.eup %870 }
 0x28c   :  { %v520_v38 = vmul.f32 %v871_v37, %v867_v22 }
 0x28e   :  { %825 = vmatprep.mubr.msk.f32.mxu0 %vm483_vm2, %v520_v38 }
 0x28f   :  { %826 = vmatmul.mubr.msk.f32.vlgmr.msra.gmra.mxu0 %vm483_vm2, %v521_v39 }
 0x34f   :  { %v827_v51 = vpop.f32.mrf.mxu0 }
 0x350   :  { %v616_v52 = vmul.f32 %v827_v51, %v612_v50 }
 0x351   :  { %v598_v53 = vpop.f32.mrf.mxu0 }
 0x352   :  { %v624_v54 = vsel %vm399_vm12, %v616_v52, 0.0  ;;  %v615_v55 = vmul.f32 %v610_v49, %v598_v53 }
 0x353   :  { %v625_v56 = vrot.slane %v624_v54, 4 }
 0x354   :  { %v617_v57 = vsel %vm399_vm12, %v615_v55, 0.0 }
 0x355   :  { %v626_v58 = vadd.f32 %v625_v56, %v624_v54  ;;  %v618_v59 = vrot.slane %v617_v57, 4 }
 0x357   :  { %v627_v60 = vrot.slane %v626_v58, 2  ;;  %v619_v61 = vadd.f32 %v618_v59, %v617_v57 }
 0x359   :  { %v628_v62 = vadd.f32 %v627_v60, %v626_v58  ;;  %v620_v63 = vrot.slane %v619_v61, 2 }
 0x35b   :  { %v629_v0 = vrot.slane %v628_v62, 1  ;;  %v621_v1 = vadd.f32 %v620_v63, %v619_v61 }
 0x35d   :  { %v622_v2 = vrot.slane %v621_v1, 1  ;;  %v630_v3 = vadd.f32 %v629_v0, %v628_v62 }
 0x35f   :  { %v623_v5 = vadd.f32 %v622_v2, %v621_v1 }
 0x361   :  { %v646_v6 = vsel %vm645_vm3, %v630_v3, %v623_v5 }
 0x362   :  { %845 = vmatmul.mubr.msk.f32.vlgmr.msra.gmra.mxu1 %vm399_vm12, %v646_v6 }
 0x422   :  { %v715_v9 = vpop.f32.mrf.mxu1 }
 0x423   :  { %v716_v10 = vadd.f32 %v715_v9, %v642_v8 }
 0x424   :  { %v846_v11 = vpop.f32.mrf.mxu1 }
 0x425   :  { %719 = vst [vmem:[#allocation13] sm:$0x3] %v716_v10 }
 0x426   :  { %1003 = shalt.err (!%p1000_p6)
}
 0x427   :  { %729 = dma.vmem_to_hbm [thread:$0]  %s727_s10, 32, %s1184_s7, [#allocation4]  }
 0x428   :  { %1020 = dma.done.wait [#allocation4], 32  }
 0x429   :  { %1021 = vsyncadd [#allocation4], 4294967264 }
 0x42a   :  { %733 = vsyncpa [#allocation3], 1 }
 0x42b   :  { %734 = vsyncpa [#allocation6], 1 }
 0x42c   :  { %735 = vsyncpa [#allocation9], 1 }
 0x42d   :  { %736 = vsyncpa [#allocation12], 1 }
 0x42e   :  { %737 = vsyncpa [#allocation4], 1 }

</bundles_post_ra>
